<compile_context>
chip_gen: v5e
topology: v5e:2x2
jax: 0.10.0
libtpu: 0.0.40
codegen_flags: <defaults>
</compile_context>

<pallas_src>
import jax
import jax.numpy as jnp
from jax.experimental import pallas as pl
from jax.experimental.pallas import tpu as pltpu

LANE = 128
MAX_BATCH_TILE = 512   # big tiles amortize ~0.35 us/grid-step; VMEM cost tiny
MIN_SPLIT = 64         # below this batch, a single grid step is cheaper


def _round_up(x, m):
    return (x + m - 1) // m * m


def _choose_tiling(batch):
    """Pick (padded_batch, batch_tile).

    Prefers >= 2 grid steps once the batch is large enough so the 'parallel'
    grid axis can shard across v7x's two TensorCores; caps the tile at
    MAX_BATCH_TILE. Batch is padded to 16 (bf16 sublane packing).
    """
    b_pad = _round_up(batch, 16)
    if b_pad < MIN_SPLIT:
        return b_pad, b_pad                      # tiny batch: one step
    tb = min(MAX_BATCH_TILE, _round_up(b_pad // 2, 16))
    b_pad = _round_up(b_pad, tb)
    return b_pad, tb


# ---------------------------------------------------------------------------
# Fused 3-layer MLP kernel (whole network in one kernel invocation).
# Weights (< 1 MB) stay resident in VMEM; intermediates never touch HBM.
# ---------------------------------------------------------------------------
def _mlp3_kernel(x_ref, w1_ref, s1_ref, w2_ref, s2_ref, w3_ref, s3_ref, o_ref):
    # Layer 1: Linear + BN(eval) folded into (w1, s1), ReLU.  Dropout = id.
    h = jnp.dot(x_ref[...], w1_ref[...], preferred_element_type=jnp.float32)
    h = jnp.maximum(h + s1_ref[...], 0.0)
    # Layer 2: Linear + BN(eval) folded, ReLU.
    h = jnp.dot(h.astype(jnp.bfloat16), w2_ref[...],
                preferred_element_type=jnp.float32)
    h = jnp.maximum(h + s2_ref[...], 0.0)
    # Layer 3: final Linear (bias only, in s3).
    o = jnp.dot(h.astype(jnp.bfloat16), w3_ref[...],
                preferred_element_type=jnp.float32)
    o_ref[...] = (o + s3_ref[...]).astype(o_ref.dtype)


def behavioral_decoder_forward(z, params):
    """Runs the fused decoder. z: (batch, latent_dim) f32."""
    batch, latent_dim = z.shape
    k_pad = params["k_pad"]
    w1, s1 = params["w1"], params["s1"]
    w2, s2 = params["w2"], params["s2"]
    w3, s3 = params["w3"], params["s3"]
    op = w3.shape[1]                 # lane-padded output dim (128)
    out_dim = params["output_dim"]

    b_pad, tb = _choose_tiling(batch)

    # Ship bf16 activations (half the DMA bytes); zero-pad rows/K lanes.
    x = jnp.zeros((b_pad, k_pad), jnp.bfloat16)
    x = x.at[:batch, :latent_dim].set(z.astype(jnp.bfloat16))

    # Constant index_map => weights/shifts fetched once, resident across steps.
    full2d = lambda arr: pl.BlockSpec(arr.shape, lambda i: (0, 0))

    out = pl.pallas_call(
        _mlp3_kernel,
        out_shape=jax.ShapeDtypeStruct((b_pad, op), jnp.float32),
        grid_spec=pltpu.PrefetchScalarGridSpec(
            num_scalar_prefetch=0,
            grid=(b_pad // tb,),
            in_specs=[
                pl.BlockSpec((tb, k_pad), lambda i: (i, 0)),   # x rows
                full2d(w1), full2d(s1),
                full2d(w2), full2d(s2),
                full2d(w3), full2d(s3),
            ],
            out_specs=pl.BlockSpec((tb, op), lambda i: (i, 0)),
        ),
        compiler_params=pltpu.CompilerParams(
            dimension_semantics=("parallel",)),
    )(x, w1, s1, w2, s2, w3, s3)
    # Slice away batch / lane padding outside the kernel.
    return out[:batch, :out_dim]


# ---------------------------------------------------------------------------
# Parameters: raw f32 (PyTorch-equivalent) + folded/padded/bf16 kernel params.
# ---------------------------------------------------------------------------
def init_raw_params(key, latent_dim, output_dim, hidden_dims):
    """f32 parameters matching the PyTorch module in eval mode."""
    dims = [latent_dim] + list(hidden_dims) + [output_dim]
    layers = []
    n = len(dims) - 1
    for i in range(n):
        prev, d = dims[i], dims[i + 1]
        key, kw, kb, km = jax.random.split(key, 4)
        bound = 1.0 / jnp.sqrt(jnp.float32(prev))
        layer = {
            "w": jax.random.uniform(kw, (prev, d), jnp.float32, -bound, bound),
            "b": jax.random.uniform(kb, (1, d), jnp.float32, -bound, bound),
        }
        if i < n - 1:   # hidden layer: BatchNorm1d running stats (eval mode)
            layer.update(
                gamma=jnp.ones((1, d), jnp.float32),
                beta=jnp.zeros((1, d), jnp.float32),
                mean=0.01 * jax.random.normal(km, (1, d), jnp.float32),
                var=jnp.ones((1, d), jnp.float32),
                eps=1e-5,
            )
        layers.append(layer)
    return {"latent_dim": latent_dim, "output_dim": output_dim,
            "layers": layers}


def fold_and_pad(raw):
    """Fold eval-mode BatchNorm into the Linear weights, pad output feature
    dims to the 128-lane width (hidden dims already are), cast weights bf16.
    The K dim of layer 1 (latent_dim) is intentionally NOT padded to 128."""
    latent_dim = raw["latent_dim"]
    k_pad = _round_up(latent_dim, 16)        # bf16 row packing; 32 stays 32
    params = {"latent_dim": latent_dim, "output_dim": raw["output_dim"],
              "k_pad": k_pad}
    prev_p = k_pad
    for i, layer in enumerate(raw["layers"]):
        w, b = layer["w"], layer["b"]
        prev, d = w.shape
        if "gamma" in layer:
            # bn(x@W + b) = x@(W*scale) + (b*scale + beta - mean*scale)
            scale = layer["gamma"] / jnp.sqrt(layer["var"] + layer["eps"])
            w = w * scale
            shift = b * scale + layer["beta"] - layer["mean"] * scale
        else:
            shift = b
        d_p = _round_up(d, LANE)
        w_pad = jnp.zeros((prev_p, d_p), jnp.float32).at[:prev, :d].set(w)
        s_pad = jnp.zeros((1, d_p), jnp.float32).at[:, :d].set(shift)
        params[f"w{i + 1}"] = w_pad.astype(jnp.bfloat16)
        params[f"s{i + 1}"] = s_pad
        prev_p = d_p
    return params


# ---------------------------------------------------------------------------
# References.
# ---------------------------------------------------------------------------
def reference_folded(z, params):
    """Mirror of the kernel math (folded, padded, bf16 weights) in plain JAX."""
    batch, latent_dim = z.shape
    k_pad = params["k_pad"]
    x = jnp.zeros((batch, k_pad), jnp.bfloat16).at[:, :latent_dim].set(
        z.astype(jnp.bfloat16))
    h = jnp.dot(x, params["w1"], preferred_element_type=jnp.float32) + params["s1"]
    h = jnp.maximum(h, 0.0)
    h = jnp.dot(h.astype(jnp.bfloat16), params["w2"],
                preferred_element_type=jnp.float32) + params["s2"]
    h = jnp.maximum(h, 0.0)
    o = jnp.dot(h.astype(jnp.bfloat16), params["w3"],
                preferred_element_type=jnp.float32) + params["s3"]
    return o[:, :params["output_dim"]]


def reference_unfolded(z, raw):
    """Pure-f32 Linear + BatchNorm1d(eval) + ReLU reference (PyTorch semantics,
    Dropout = identity). Independent of the fold / pad / bf16 path."""
    h = z
    for layer in raw["layers"]:
        h = h @ layer["w"] + layer["b"]
        if "gamma" in layer:
            h = (h - layer["mean"]) / jnp.sqrt(layer["var"] + layer["eps"])
            h = h * layer["gamma"] + layer["beta"]
            h = jnp.maximum(h, 0.0)
    return h


if __name__ == "__main__":
    key = jax.random.PRNGKey(0)

    # Small shapes consistent with the module signature / defaults.
    batch = 8
    latent_dim = 32
    hidden_dims = (256, 512)
    output_dim = 64

    key, kz, kp = jax.random.split(key, 3)
    z = jax.random.normal(kz, (batch, latent_dim), jnp.float32)
    raw = init_raw_params(kp, latent_dim, output_dim, hidden_dims)
    params = fold_and_pad(raw)

    out = jax.block_until_ready(behavioral_decoder_forward(z, params))
    assert out.shape == (batch, output_dim)

    # 1) Exact mirror of the kernel math (catches kernel / BlockSpec bugs).
    ref_f = reference_folded(z, params)
    assert jnp.allclose(out, ref_f, atol=1e-3, rtol=1e-3), \
        "mismatch vs folded bf16 reference"

    # 2) Unfolded pure-f32 module (catches BN-fold / padding bugs). Looser
    #    tolerance because weights/activations run in bf16 on the MXU.
    ref_u = reference_unfolded(z, raw)
    assert jnp.allclose(out, ref_u, atol=5e-2, rtol=5e-2), \
        "mismatch vs unfolded f32 reference"

    print("KERNEL_OK")
</pallas_src>

<mosaic_0001>
module attributes {stable_mosaic.version = 11 : i64} {
  func.func @_mlp3_kernel(%arg0: i32, %arg1: memref<16x32xbf16, #tpu.memory_space<vmem>>, %arg2: memref<32x256xbf16, #tpu.memory_space<vmem>>, %arg3: memref<1x256xf32, #tpu.memory_space<vmem>>, %arg4: memref<256x512xbf16, #tpu.memory_space<vmem>>, %arg5: memref<1x512xf32, #tpu.memory_space<vmem>>, %arg6: memref<512x128xbf16, #tpu.memory_space<vmem>>, %arg7: memref<1x128xf32, #tpu.memory_space<vmem>>, %arg8: memref<16x128xf32, #tpu.memory_space<vmem>>) attributes {dimension_semantics = [#tpu.dimension_semantics<parallel>], iteration_bounds = array<i64: 1>, scalar_prefetch = 0 : i64, scratch_operands = 0 : i64, tpu.core_type = #tpu.core_type<tc>, window_params = [{transform_indices = @transform_0, window_bounds = array<i64: 16, 32>}, {pipeline_mode = #tpu.pipeline_mode<synchronous>, transform_indices = @transform_1, window_bounds = array<i64: 32, 256>}, {pipeline_mode = #tpu.pipeline_mode<synchronous>, transform_indices = @transform_2, window_bounds = array<i64: 1, 256>}, {pipeline_mode = #tpu.pipeline_mode<synchronous>, transform_indices = @transform_3, window_bounds = array<i64: 256, 512>}, {pipeline_mode = #tpu.pipeline_mode<synchronous>, transform_indices = @transform_4, window_bounds = array<i64: 1, 512>}, {pipeline_mode = #tpu.pipeline_mode<synchronous>, transform_indices = @transform_5, window_bounds = array<i64: 512, 128>}, {pipeline_mode = #tpu.pipeline_mode<synchronous>, transform_indices = @transform_6, window_bounds = array<i64: 1, 128>}, {transform_indices = @transform_7, window_bounds = array<i64: 16, 128>}]} {
    %c0 = arith.constant 0 : index
    %c0_0 = arith.constant 0 : index
    %0 = vector.load %arg1[%c0, %c0_0] : memref<16x32xbf16, #tpu.memory_space<vmem>>, vector<16x32xbf16>
    %c0_1 = arith.constant 0 : index
    %c0_2 = arith.constant 0 : index
    %1 = vector.load %arg2[%c0_1, %c0_2] : memref<32x256xbf16, #tpu.memory_space<vmem>>, vector<32x256xbf16>
    %cst = arith.constant dense<0.000000e+00> : vector<16x256xf32>
    %2 = tpu.matmul %0, %1, %cst {dimension_numbers = #tpu.dot_dimension_numbers<[1], [0], [0], [1], [0, 0, 1, 1], [], []>} : vector<16x32xbf16>, vector<32x256xbf16>, vector<16x256xf32> -> vector<16x256xf32>
    %c0_3 = arith.constant 0 : index
    %c0_4 = arith.constant 0 : index
    %3 = vector.load %arg3[%c0_3, %c0_4] : memref<1x256xf32, #tpu.memory_space<vmem>>, vector<1x256xf32>
    %4 = vector.broadcast %3 : vector<1x256xf32> to vector<16x256xf32>
    %5 = arith.addf %2, %4 : vector<16x256xf32>
    %cst_5 = arith.constant 0.000000e+00 : f32
    %6 = vector.broadcast %cst_5 : f32 to vector<16x256xf32>
    %7 = arith.maximumf %5, %6 : vector<16x256xf32>
    %8 = arith.truncf %7 : vector<16x256xf32> to vector<16x256xbf16>
    %c0_6 = arith.constant 0 : index
    %c0_7 = arith.constant 0 : index
    %9 = vector.load %arg4[%c0_6, %c0_7] : memref<256x512xbf16, #tpu.memory_space<vmem>>, vector<256x512xbf16>
    %cst_8 = arith.constant dense<0.000000e+00> : vector<16x512xf32>
    %10 = tpu.matmul %8, %9, %cst_8 {dimension_numbers = #tpu.dot_dimension_numbers<[1], [0], [0], [1], [0, 0, 1, 1], [], []>} : vector<16x256xbf16>, vector<256x512xbf16>, vector<16x512xf32> -> vector<16x512xf32>
    %c0_9 = arith.constant 0 : index
    %c0_10 = arith.constant 0 : index
    %11 = vector.load %arg5[%c0_9, %c0_10] : memref<1x512xf32, #tpu.memory_space<vmem>>, vector<1x512xf32>
    %12 = vector.broadcast %11 : vector<1x512xf32> to vector<16x512xf32>
    %13 = arith.addf %10, %12 : vector<16x512xf32>
    %cst_11 = arith.constant 0.000000e+00 : f32
    %14 = vector.broadcast %cst_11 : f32 to vector<16x512xf32>
    %15 = arith.maximumf %13, %14 : vector<16x512xf32>
    %16 = arith.truncf %15 : vector<16x512xf32> to vector<16x512xbf16>
    %c0_12 = arith.constant 0 : index
    %c0_13 = arith.constant 0 : index
    %17 = vector.load %arg6[%c0_12, %c0_13] : memref<512x128xbf16, #tpu.memory_space<vmem>>, vector<512x128xbf16>
    %cst_14 = arith.constant dense<0.000000e+00> : vector<16x128xf32>
    %18 = tpu.matmul %16, %17, %cst_14 {dimension_numbers = #tpu.dot_dimension_numbers<[1], [0], [0], [1], [0, 0, 1, 1], [], []>} : vector<16x512xbf16>, vector<512x128xbf16>, vector<16x128xf32> -> vector<16x128xf32>
    %c0_15 = arith.constant 0 : index
    %c0_16 = arith.constant 0 : index
    %19 = vector.load %arg7[%c0_15, %c0_16] : memref<1x128xf32, #tpu.memory_space<vmem>>, vector<1x128xf32>
    %20 = vector.broadcast %19 : vector<1x128xf32> to vector<16x128xf32>
    %21 = arith.addf %18, %20 : vector<16x128xf32>
    %c0_17 = arith.constant 0 : index
    %c0_18 = arith.constant 0 : index
    %22 = vector.load %arg8[%c0_17, %c0_18] : memref<16x128xf32, #tpu.memory_space<vmem>>, vector<16x128xf32>
    tpu.vector_store %arg8[%c0_17, %c0_18], %21 {strides = array<i32>} : memref<16x128xf32, #tpu.memory_space<vmem>>, vector<16x128xf32>,
    return
  }
  func.func @transform_0(%arg0: i32) -> (i32, i32) {
    %c0_i32 = arith.constant 0 : i32
    %c0_i32_0 = arith.constant 0 : i32
    return %arg0, %c0_i32 : i32, i32
  }
  func.func @transform_1(%arg0: i32) -> (i32, i32) {
    %c0_i32 = arith.constant 0 : i32
    %c0_i32_0 = arith.constant 0 : i32
    %c0_i32_1 = arith.constant 0 : i32
    return %c0_i32, %c0_i32_0 : i32, i32
  }
  func.func @transform_2(%arg0: i32) -> (i32, i32) {
    %c0_i32 = arith.constant 0 : i32
    %c0_i32_0 = arith.constant 0 : i32
    %c0_i32_1 = arith.constant 0 : i32
    return %c0_i32, %c0_i32_0 : i32, i32
  }
  func.func @transform_3(%arg0: i32) -> (i32, i32) {
    %c0_i32 = arith.constant 0 : i32
    %c0_i32_0 = arith.constant 0 : i32
    %c0_i32_1 = arith.constant 0 : i32
    return %c0_i32, %c0_i32_0 : i32, i32
  }
  func.func @transform_4(%arg0: i32) -> (i32, i32) {
    %c0_i32 = arith.constant 0 : i32
    %c0_i32_0 = arith.constant 0 : i32
    %c0_i32_1 = arith.constant 0 : i32
    return %c0_i32, %c0_i32_0 : i32, i32
  }
  func.func @transform_5(%arg0: i32) -> (i32, i32) {
    %c0_i32 = arith.constant 0 : i32
    %c0_i32_0 = arith.constant 0 : i32
    %c0_i32_1 = arith.constant 0 : i32
    return %c0_i32, %c0_i32_0 : i32, i32
  }
  func.func @transform_6(%arg0: i32) -> (i32, i32) {
    %c0_i32 = arith.constant 0 : i32
    %c0_i32_0 = arith.constant 0 : i32
    %c0_i32_1 = arith.constant 0 : i32
    return %c0_i32, %c0_i32_0 : i32, i32
  }
  func.func @transform_7(%arg0: i32) -> (i32, i32) {
    %c0_i32 = arith.constant 0 : i32
    %c0_i32_0 = arith.constant 0 : i32
    return %arg0, %c0_i32 : i32, i32
  }
}

</mosaic_0001>

<bundles_post_ra>
// kernel: tpu_custom_call.1
= control target key start
LH: loop header
LB: loop body
LE: loop exit
PB: predicated region body
PF: predicated region fallthrough
CT: control target
= control target key end

     0   :  { %12 = vsyncpa [#allocation3], 0  ;;  %s1835_s0 = inlined_call_operand.hbm [shape: bf16[16,32], index: 0, kind: input, shape index: {}]   ;;  %s1836_s1 = inlined_call_operand.hbm [shape: bf16[32,256], index: 1, kind: input, shape index: {}]   ;;  %s1837_s2 = inlined_call_operand.hbm [shape: f32[1,256], index: 2, kind: input, shape index: {}]   ;;  %s1838_s3 = inlined_call_operand.hbm [shape: bf16[256,512], index: 3, kind: input, shape index: {}]   ;;  %s1839_s4 = inlined_call_operand.hbm [shape: f32[1,512], index: 4, kind: input, shape index: {}]   ;;  %s1840_s5 = inlined_call_operand.hbm [shape: bf16[512,128], index: 5, kind: input, shape index: {}]   ;;  %s1841_s6 = inlined_call_operand.vmem [shape: f32[1,128], index: 6, kind: input, shape index: {}]   ;;  %s1842_s7 = inlined_call_operand.hbm [shape: f32[16,128], index: 7, kind: output, shape index: {}]  }
   0x1   :  { %13 = vsyncpa [#allocation6], 0 }
   0x2   :  { %14 = vsyncpa [#allocation9], 0 }
   0x3   :  { %15 = vsyncpa [#allocation12], 0  ;;  %s34_s26 = sshll.u32 %s1836_s1, 4  ;;  %s35_s26 = int_to_ptr.hbm [resolvable:$true] %s34_s26 }
   0x4   :  { %16 = vsyncpa [#allocation4], 0  ;;  %s1750_s27 = smov [#allocation5]   ;;  %s58_s8 = sshll.u32 %s1838_s3, 4  ;;  %s59_s8 = int_to_ptr.hbm [resolvable:$true] %s58_s8 }
   0x5   :  { %s36_s28 = sshll.u32 %s1750_s27, 4  ;;  %s1751_s9 = smov 128   ;;  %s37_s28 = int_to_ptr.vmem [resolvable:$true] %s36_s28 }
   0x6   :  { %s1752_s10 = smov 8   ;;  %s1753_s11 = smov [#allocation8]  }
   0x7   :  { %42 = dma.hbm_to_vmem [thread:$0]  %s35_s26, 512, %s37_s28, [#allocation6], %s1751_s9, %s1751_s9, %s1752_s10  }
   0x8   :  { %s60_s12 = sshll.u32 %s1753_s11, 4  ;;  %s1754_s1 = smov 256   ;;  %s61_s12 = int_to_ptr.vmem [resolvable:$true] %s60_s12 }
   0x9   :  { %s1755_s13 = smov 16   ;;  %s21_s16 = sshll.u32 %s1835_s0, 4  ;;  %s22_s16 = int_to_ptr.hbm [resolvable:$true] %s21_s16 }
   0xa   :  { %66 = dma.hbm_to_vmem [thread:$0]  %s59_s8, 8192, %s61_s12, [#allocation9], %s1754_s1, %s1754_s1, %s1755_s13  }
   0xb   :  { %s1756_s17 = smov [#allocation2]   ;;  %s48_s20 = sshll.u32 %s1837_s2, 4  ;;  %s49_s20 = int_to_ptr.hbm [resolvable:$true] %s48_s20 }
   0xc   :  { %s23_s3 = sshll.u32 %s1756_s17, 4  ;;  %s1757_s21 = smov 64   ;;  %s24_s3 = int_to_ptr.vmem [resolvable:$true] %s23_s3 }
   0xd   :  { %s1758_s22 = smov 4   ;;  %s1759_s23 = smov [#allocation7]  }
   0xe   :  { %29 = dma.hbm_to_vmem [thread:$0]  %s22_s16, 128, %s24_s3, [#allocation3], %s1757_s21, %s1757_s21, %s1758_s22  }
   0xf   :  { %s50_s24 = sshll.u32 %s1759_s23, 4  ;;  %s72_s27 = sshll.u32 %s1839_s4, 4  ;;  %s51_s24 = int_to_ptr.vmem [resolvable:$true] %s50_s24  ;;  %s73_s27 = int_to_ptr.hbm [resolvable:$true] %s72_s27 }
  0x10   :  { %53 = dma.hbm_to_vmem [thread:$0]  %s49_s20, 32, %s51_s24, [#allocation6]  }
  0x11   :  { %s82_s29 = sshll.u32 %s1840_s5, 4  ;;  %s1760_s30 = smov [#allocation10]   ;;  %s83_s29 = int_to_ptr.hbm [resolvable:$true] %s82_s29 }
  0x12   :  { %s74_s8 = sshll.u32 %s1760_s30, 4  ;;  %s1761_s2 = smov [#allocation11]   ;;  %s75_s8 = int_to_ptr.vmem [resolvable:$true] %s74_s8 }
  0x13   :  { %77 = dma.hbm_to_vmem [thread:$0]  %s73_s27, 64, %s75_s8, [#allocation9]  }
  0x14   :  { %s84_s11 = sshll.u32 %s1761_s2, 4  ;;  %s85_s11 = int_to_ptr.vmem [resolvable:$true] %s84_s11 }
  0x15   :  { %90 = dma.hbm_to_vmem [thread:$0]  %s83_s29, 4096, %s85_s11, [#allocation12], %s1757_s21, %s1757_s21, %s1758_s22  }
  0x16   :  { %1740 = dma.done.wait [#allocation3], 128  }
  0x17   :  { %1741 = vsyncadd [#allocation3], 4294967168 }
  0x18   :  { %1742 = dma.done.wait [#allocation6], 544  }
  0x19   :  { %1743 = vsyncadd [#allocation6], 4294966752 }
  0x1a   :  { %1744 = dma.done.wait [#allocation9], 8256  }
  0x1b   :  { %1745 = vsyncadd [#allocation9], 4294959040 }
  0x1c   :  { %1746 = dma.done.wait [#allocation12], 4096  }
  0x1d   :  { %1747 = vsyncadd [#allocation12], 4294963200  ;;  %v1065_v0 = vld [vmem:[#allocation5 + $0x10] sm:$0xf]  ;;  %v1461_v1 = vld [vmem:[#allocation5 + $0x14] sm:$0xf0] }
  0x1e   :  { %v1460_v2 = vld [vmem:[#allocation5 + $0x14] sm:$0xf]  ;;  %v1066_v3 = vor.u32 %v1461_v1, %v1065_v0  ;;  %v1067_v4 = vld [vmem:[#allocation5 + $0x18] sm:$0xf0]  ;;  %v1057_v5 = vld [vmem:[#allocation5] sm:$0xf] }
  0x1f   :  { %v1459_v6 = vld [vmem:[#allocation5 + $0x4] sm:$0xf0]  ;;  %v1070_v7 = vor.u32 %v1460_v2, %v1067_v4  ;;  %v1458_v8 = vld [vmem:[#allocation5 + $0x4] sm:$0xf]  ;;  %v1059_v9 = vld [vmem:[#allocation5 + $0x8] sm:$0xf0] }
  0x20   :  { %vm155_vm0 = vcmask 261120   ;;  %165 = vmatpush.bf16.msra.mxu0 %v1066_v3  ;;  %v1058_v10 = vor.u32 %v1459_v6, %v1057_v5  ;;  %v1187_v11 = vld [vmem:[#allocation8 + $0xe0] sm:$0xf]  ;;  %v1492_v12 = vld [vmem:[#allocation8 + $0xec] sm:$0xf0]  ;;  %v1062_v14 = vor.u32 %v1458_v8, %v1059_v9  ;;  %v1457_v15 = vld [vmem:[#allocation2] sm:$0xff] }
  0x21   :  { %v1315_v13 = vld [vmem:[#allocation8 + $0x1e0] sm:$0xf]  ;;  %179 = vmatpush.bf16.msra.mxu1 %v1070_v7  ;;  %v1188_v16 = vor.u32 %v1492_v12, %v1187_v11  ;;  %v1524_v17 = vld [vmem:[#allocation8 + $0x1ec] sm:$0xf0]  ;;  %v1490_v18 = vld [vmem:[#allocation8 + $0xe4] sm:$0xf] }
  0x22   :  { %v1189_v19 = vld [vmem:[#allocation8 + $0xf0] sm:$0xf0]  ;;  %v1316_v20 = vor.u32 %v1524_v17, %v1315_v13  ;;  %v1522_v22 = vld [vmem:[#allocation8 + $0x1e4] sm:$0xf]  ;;  %v1171_v24 = vld [vmem:[#allocation8 + $0xc0] sm:$0xf] }
  0x23   :  { %v1192_v21 = vor.u32 %v1490_v18, %v1189_v19  ;;  %v1317_v23 = vld [vmem:[#allocation8 + $0x1f0] sm:$0xf0]  ;;  %587 = vmatpush.bf16.msra.mxu2 %v1188_v16  ;;  %v1488_v26 = vld [vmem:[#allocation8 + $0xcc] sm:$0xf0]  ;;  %v1299_v27 = vld [vmem:[#allocation8 + $0x1c0] sm:$0xf] }
  0x24   :  { %v1320_v25 = vor.u32 %v1522_v22, %v1317_v23  ;;  %v1520_v28 = vld [vmem:[#allocation8 + $0x1cc] sm:$0xf0]  ;;  %166 = vmatpush.bf16.msra.mxu0 %v1058_v10  ;;  %601 = vmatpush.bf16.msra.mxu3 %v1316_v20  ;;  %v1172_v29 = vor.u32 %v1488_v26, %v1171_v24  ;;  %v1486_v31 = vld [vmem:[#allocation8 + $0xc4] sm:$0xf]  ;;  %v1173_v32 = vld [vmem:[#allocation8 + $0xd0] sm:$0xf0] }
  0x25   :  { %v1300_v30 = vor.u32 %v1520_v28, %v1299_v27  ;;  %v1518_v33 = vld [vmem:[#allocation8 + $0x1c4] sm:$0xf]  ;;  %180 = vmatpush.bf16.msra.mxu1 %v1062_v14  ;;  %v1176_v34 = vor.u32 %v1486_v31, %v1173_v32  ;;  %v1301_v35 = vld [vmem:[#allocation8 + $0x1d0] sm:$0xf0]  ;;  %v1155_v36 = vld [vmem:[#allocation8 + $0xa0] sm:$0xf] }
  0x26   :  { %v1484_v37 = vld [vmem:[#allocation8 + $0xac] sm:$0xf0]  ;;  %v1304_v38 = vor.u32 %v1518_v33, %v1301_v35  ;;  %v1283_v39 = vld [vmem:[#allocation8 + $0x1a0] sm:$0xf]  ;;  %v1482_v41 = vld [vmem:[#allocation8 + $0xa4] sm:$0xf] }
  0x27   :  { %v1516_v40 = vld [vmem:[#allocation8 + $0x1ac] sm:$0xf0]  ;;  %1071 = vmatmul.msk.bf16.vlgmr.msra.gmra.mxu0 %vm155_vm0, %v1457_v15  ;;  %588 = vmatpush.bf16.msra.mxu2 %v1172_v29  ;;  %v1156_v42 = vor.u32 %v1484_v37, %v1155_v36  ;;  %v1157_v43 = vld [vmem:[#allocation8 + $0xb0] sm:$0xf0]  ;;  %v1514_v44 = vld [vmem:[#allocation8 + $0x1a4] sm:$0xf] }
  0x28   :  { %615 = vmatpush.bf16.msrb.mxu0 %v1192_v21  ;;  %v1285_v45 = vld [vmem:[#allocation8 + $0x1b0] sm:$0xf0]  ;;  %1072 = vmatmul.msk.bf16.vlgmr.msra.gmra.mxu1 %vm155_vm0, %v1457_v15  ;;  %v1284_v46 = vor.u32 %v1516_v40, %v1283_v39  ;;  %v1139_v47 = vld [vmem:[#allocation8 + $0x80] sm:$0xf]  ;;  %v1480_v48 = vld [vmem:[#allocation8 + $0x8c] sm:$0xf0]  ;;  %v1160_v49 = vor.u32 %v1482_v41, %v1157_v43 }
  0x29   :  { %629 = vmatpush.bf16.msrb.mxu1 %v1320_v25  ;;  %602 = vmatpush.bf16.msra.mxu3 %v1300_v30  ;;  %v1267_v50 = vld [vmem:[#allocation8 + $0x180] sm:$0xf]  ;;  %v1512_v51 = vld [vmem:[#allocation8 + $0x18c] sm:$0xf0]  ;;  %v1288_v52 = vor.u32 %v1514_v44, %v1285_v45  ;;  %v1478_v53 = vld [vmem:[#allocation8 + $0x84] sm:$0xf]  ;;  %v1140_v55 = vor.u32 %v1480_v48, %v1139_v47 }
  0x2a   :  { %v1141_v54 = vld [vmem:[#allocation8 + $0x90] sm:$0xf0]  ;;  %v1510_v56 = vld [vmem:[#allocation8 + $0x184] sm:$0xf]  ;;  %v1268_v58 = vor.u32 %v1512_v51, %v1267_v50  ;;  %v1123_v59 = vld [vmem:[#allocation8 + $0x60] sm:$0xf] }
  0x2b   :  { %589 = vmatpush.bf16.msra.mxu2 %v1156_v42  ;;  %v1269_v57 = vld [vmem:[#allocation8 + $0x190] sm:$0xf0]  ;;  %v1476_v60 = vld [vmem:[#allocation8 + $0x6c] sm:$0xf0]  ;;  %v1144_v61 = vor.u32 %v1478_v53, %v1141_v54  ;;  %v1251_v62 = vld [vmem:[#allocation8 + $0x160] sm:$0xf] }
  0x2c   :  { %616 = vmatpush.bf16.msrb.mxu0 %v1176_v34  ;;  %v1508_v63 = vld [vmem:[#allocation8 + $0x16c] sm:$0xf0]  ;;  %v1272_v0 = vor.u32 %v1510_v56, %v1269_v57  ;;  %v1474_v1 = vld [vmem:[#allocation8 + $0x64] sm:$0xf]  ;;  %v1125_v2 = vld [vmem:[#allocation8 + $0x70] sm:$0xf0]  ;;  %v1124_v3 = vor.u32 %v1476_v60, %v1123_v59 }
  0x2d   :  { %630 = vmatpush.bf16.msrb.mxu1 %v1304_v38  ;;  %603 = vmatpush.bf16.msra.mxu3 %v1284_v46  ;;  %v1506_v4 = vld [vmem:[#allocation8 + $0x164] sm:$0xf]  ;;  %v1253_v5 = vld [vmem:[#allocation8 + $0x170] sm:$0xf0]  ;;  %v1252_v6 = vor.u32 %v1508_v63, %v1251_v62  ;;  %v1107_v7 = vld [vmem:[#allocation8 + $0x40] sm:$0xf]  ;;  %v1128_v9 = vor.u32 %v1474_v1, %v1125_v2 }
  0x2e   :  { %v1472_v8 = vld [vmem:[#allocation8 + $0x4c] sm:$0xf0]  ;;  %v1235_v10 = vld [vmem:[#allocation8 + $0x140] sm:$0xf]  ;;  %v1256_v12 = vor.u32 %v1506_v4, %v1253_v5  ;;  %v1470_v13 = vld [vmem:[#allocation8 + $0x44] sm:$0xf] }
  0x2f   :  { %590 = vmatpush.bf16.msra.mxu2 %v1140_v55  ;;  %v1504_v11 = vld [vmem:[#allocation8 + $0x14c] sm:$0xf0]  ;;  %v1109_v14 = vld [vmem:[#allocation8 + $0x50] sm:$0xf0]  ;;  %v1108_v15 = vor.u32 %v1472_v8, %v1107_v7  ;;  %v1502_v16 = vld [vmem:[#allocation8 + $0x144] sm:$0xf] }
  0x30   :  { %617 = vmatpush.bf16.msrb.mxu0 %v1160_v49  ;;  %v1237_v17 = vld [vmem:[#allocation8 + $0x150] sm:$0xf0]  ;;  %v1236_v18 = vor.u32 %v1504_v11, %v1235_v10  ;;  %v1091_v19 = vld [vmem:[#allocation8 + $0x20] sm:$0xf]  ;;  %v1468_v20 = vld [vmem:[#allocation8 + $0x2c] sm:$0xf0]  ;;  %v1112_v21 = vor.u32 %v1470_v13, %v1109_v14 }
  0x31   :  { %631 = vmatpush.bf16.msrb.mxu1 %v1288_v52  ;;  %604 = vmatpush.bf16.msra.mxu3 %v1268_v58  ;;  %v1219_v22 = vld [vmem:[#allocation8 + $0x120] sm:$0xf]  ;;  %v1500_v23 = vld [vmem:[#allocation8 + $0x12c] sm:$0xf0]  ;;  %v1240_v24 = vor.u32 %v1502_v16, %v1237_v17  ;;  %v1466_v25 = vld [vmem:[#allocation8 + $0x24] sm:$0xf]  ;;  %v1092_v27 = vor.u32 %v1468_v20, %v1091_v19 }
  0x32   :  { %v1093_v26 = vld [vmem:[#allocation8 + $0x30] sm:$0xf0]  ;;  %v1498_v28 = vld [vmem:[#allocation8 + $0x124] sm:$0xf]  ;;  %v1220_v30 = vor.u32 %v1500_v23, %v1219_v22  ;;  %v1075_v31 = vld [vmem:[#allocation8] sm:$0xf] }
  0x33   :  { %591 = vmatpush.bf16.msra.mxu2 %v1124_v3  ;;  %v1221_v29 = vld [vmem:[#allocation8 + $0x130] sm:$0xf0]  ;;  %v1464_v32 = vld [vmem:[#allocation8 + $0xc] sm:$0xf0]  ;;  %v1096_v33 = vor.u32 %v1466_v25, %v1093_v26  ;;  %v1203_v34 = vld [vmem:[#allocation8 + $0x100] sm:$0xf] }
  0x34   :  { %618 = vmatpush.bf16.msrb.mxu0 %v1144_v61  ;;  %v1496_v35 = vld [vmem:[#allocation8 + $0x10c] sm:$0xf0]  ;;  %v1224_v36 = vor.u32 %v1498_v28, %v1221_v29  ;;  %v1462_v37 = vld [vmem:[#allocation8 + $0x4] sm:$0xf]  ;;  %v1077_v38 = vld [vmem:[#allocation8 + $0x10] sm:$0xf0]  ;;  %v1076_v39 = vor.u32 %v1464_v32, %v1075_v31 }
  0x35   :  { %632 = vmatpush.bf16.msrb.mxu1 %v1272_v0  ;;  %605 = vmatpush.bf16.msra.mxu3 %v1252_v6  ;;  %v1494_v40 = vld [vmem:[#allocation8 + $0x104] sm:$0xf]  ;;  %v1205_v41 = vld [vmem:[#allocation8 + $0x110] sm:$0xf0]  ;;  %v1204_v42 = vor.u32 %v1496_v35, %v1203_v34  ;;  %v1080_v43 = vor.u32 %v1462_v37, %v1077_v38  ;;  %v1195_v45 = vld [vmem:[#allocation8 + $0xe8] sm:$0xf] }
  0x36   :  { %v1208_v44 = vor.u32 %v1494_v40, %v1205_v41  ;;  %v1493_v46 = vld [vmem:[#allocation8 + $0xf4] sm:$0xf0]  ;;  %v1323_v47 = vld [vmem:[#allocation8 + $0x1e8] sm:$0xf]  ;;  %v1491_v50 = vld [vmem:[#allocation8 + $0xec] sm:$0xf] }
  0x37   :  { %592 = vmatpush.bf16.msra.mxu2 %v1108_v15  ;;  %v1196_v48 = vor.u32 %v1493_v46, %v1195_v45  ;;  %v1525_v49 = vld [vmem:[#allocation8 + $0x1f4] sm:$0xf0]  ;;  %v1197_v51 = vld [vmem:[#allocation8 + $0xf8] sm:$0xf0]  ;;  %v1523_v54 = vld [vmem:[#allocation8 + $0x1ec] sm:$0xf] }
  0x38   :  { %619 = vmatpush.bf16.msrb.mxu0 %v1128_v9  ;;  %v1324_v52 = vor.u32 %v1525_v49, %v1323_v47  ;;  %v1200_v53 = vor.u32 %v1491_v50, %v1197_v51  ;;  %v1325_v55 = vld [vmem:[#allocation8 + $0x1f8] sm:$0xf0]  ;;  %v1179_v57 = vld [vmem:[#allocation8 + $0xc8] sm:$0xf]  ;;  %v1489_v58 = vld [vmem:[#allocation8 + $0xd4] sm:$0xf0] }
  0x39   :  { %633 = vmatpush.bf16.msrb.mxu1 %v1256_v12  ;;  %606 = vmatpush.bf16.msra.mxu3 %v1236_v18  ;;  %v1328_v56 = vor.u32 %v1523_v54, %v1325_v55  ;;  %v1180_v59 = vor.u32 %v1489_v58, %v1179_v57  ;;  %v1307_v60 = vld [vmem:[#allocation8 + $0x1c8] sm:$0xf]  ;;  %v1521_v61 = vld [vmem:[#allocation8 + $0x1d4] sm:$0xf0]  ;;  %v1487_v62 = vld [vmem:[#allocation8 + $0xcc] sm:$0xf] }
  0x3a   :  { %v1308_v63 = vor.u32 %v1521_v61, %v1307_v60  ;;  %v1181_v0 = vld [vmem:[#allocation8 + $0xd8] sm:$0xf0]  ;;  %v1519_v1 = vld [vmem:[#allocation8 + $0x1cc] sm:$0xf]  ;;  %v1163_v5 = vld [vmem:[#allocation8 + $0xa8] sm:$0xf] }
  0x3b   :  { %593 = vmatpush.bf16.msra.mxu2 %v1092_v27  ;;  %v1309_v2 = vld [vmem:[#allocation8 + $0x1d8] sm:$0xf0]  ;;  %v1184_v3 = vor.u32 %v1487_v62, %v1181_v0  ;;  %v1485_v6 = vld [vmem:[#allocation8 + $0xb4] sm:$0xf0]  ;;  %v1291_v7 = vld [vmem:[#allocation8 + $0x1a8] sm:$0xf] }
  0x3c   :  { %620 = vmatpush.bf16.msrb.mxu0 %v1112_v21  ;;  %v1312_v4 = vor.u32 %v1519_v1, %v1309_v2  ;;  %v1164_v8 = vor.u32 %v1485_v6, %v1163_v5  ;;  %v1517_v9 = vld [vmem:[#allocation8 + $0x1b4] sm:$0xf0]  ;;  %v1483_v10 = vld [vmem:[#allocation8 + $0xac] sm:$0xf]  ;;  %v1165_v11 = vld [vmem:[#allocation8 + $0xb8] sm:$0xf0] }
  0x3d   :  { %634 = vmatpush.bf16.msrb.mxu1 %v1240_v24  ;;  %607 = vmatpush.bf16.msra.mxu3 %v1220_v30  ;;  %v1292_v12 = vor.u32 %v1517_v9, %v1291_v7  ;;  %v1168_v13 = vor.u32 %v1483_v10, %v1165_v11  ;;  %v1515_v14 = vld [vmem:[#allocation8 + $0x1ac] sm:$0xf]  ;;  %v1293_v15 = vld [vmem:[#allocation8 + $0x1b8] sm:$0xf0]  ;;  %v1147_v17 = vld [vmem:[#allocation8 + $0x88] sm:$0xf] }
  0x3e   :  { %v1296_v16 = vor.u32 %v1515_v14, %v1293_v15  ;;  %v1481_v18 = vld [vmem:[#allocation8 + $0x94] sm:$0xf0]  ;;  %v1275_v19 = vld [vmem:[#allocation8 + $0x188] sm:$0xf]  ;;  %v1479_v22 = vld [vmem:[#allocation8 + $0x8c] sm:$0xf] }
  0x3f   :  { %594 = vmatpush.bf16.msra.mxu2 %v1076_v39  ;;  %v1148_v20 = vor.u32 %v1481_v18, %v1147_v17  ;;  %v1513_v21 = vld [vmem:[#allocation8 + $0x194] sm:$0xf0]  ;;  %v1149_v23 = vld [vmem:[#allocation8 + $0x98] sm:$0xf0]  ;;  %v1511_v26 = vld [vmem:[#allocation8 + $0x18c] sm:$0xf] }
  0x40   :  { %621 = vmatpush.bf16.msrb.mxu0 %v1096_v33  ;;  %v1276_v24 = vor.u32 %v1513_v21, %v1275_v19  ;;  %v1152_v25 = vor.u32 %v1479_v22, %v1149_v23  ;;  %v1277_v27 = vld [vmem:[#allocation8 + $0x198] sm:$0xf0]  ;;  %v1131_v29 = vld [vmem:[#allocation8 + $0x68] sm:$0xf]  ;;  %v1477_v30 = vld [vmem:[#allocation8 + $0x74] sm:$0xf0] }
  0x41   :  { %635 = vmatpush.bf16.msrb.mxu1 %v1224_v36  ;;  %608 = vmatpush.bf16.msra.mxu3 %v1204_v42  ;;  %v1280_v28 = vor.u32 %v1511_v26, %v1277_v27  ;;  %v1259_v31 = vld [vmem:[#allocation8 + $0x168] sm:$0xf]  ;;  %v1132_v32 = vor.u32 %v1477_v30, %v1131_v29  ;;  %v1509_v33 = vld [vmem:[#allocation8 + $0x174] sm:$0xf0]  ;;  %v1475_v34 = vld [vmem:[#allocation8 + $0x6c] sm:$0xf] }
  0x42   :  { %v1133_v35 = vld [vmem:[#allocation8 + $0x78] sm:$0xf0]  ;;  %v1260_v36 = vor.u32 %v1509_v33, %v1259_v31  ;;  %v1507_v38 = vld [vmem:[#allocation8 + $0x16c] sm:$0xf]  ;;  %v1115_v40 = vld [vmem:[#allocation8 + $0x48] sm:$0xf] }
  0x43   :  { %643 = vmatpush.bf16.msrb.mxu2 %v1196_v48  ;;  %v1136_v37 = vor.u32 %v1475_v34, %v1133_v35  ;;  %v1261_v39 = vld [vmem:[#allocation8 + $0x178] sm:$0xf0]  ;;  %v1473_v42 = vld [vmem:[#allocation8 + $0x54] sm:$0xf0]  ;;  %v1471_v47 = vld [vmem:[#allocation8 + $0x4c] sm:$0xf] }
  0x44   :  { %622 = vmatpush.bf16.msrb.mxu0 %v1080_v43  ;;  %v1264_v41 = vor.u32 %v1507_v38, %v1261_v39  ;;  %v1243_v43 = vld [vmem:[#allocation8 + $0x148] sm:$0xf]  ;;  %v1116_v45 = vor.u32 %v1473_v42, %v1115_v40  ;;  %v1117_v48 = vld [vmem:[#allocation8 + $0x58] sm:$0xf0]  ;;  %v1503_v49 = vld [vmem:[#allocation8 + $0x14c] sm:$0xf] }
  0x45   :  { %636 = vmatpush.bf16.msrb.mxu1 %v1208_v44  ;;  %657 = vmatpush.bf16.msrb.mxu3 %v1324_v52  ;;  %v1505_v44 = vld [vmem:[#allocation8 + $0x154] sm:$0xf0]  ;;  %v1120_v50 = vor.u32 %v1471_v47, %v1117_v48  ;;  %v1245_v51 = vld [vmem:[#allocation8 + $0x158] sm:$0xf0]  ;;  %v1099_v52 = vld [vmem:[#allocation8 + $0x28] sm:$0xf] }
  0x46   :  { %v1244_v46 = vor.u32 %v1505_v44, %v1243_v43  ;;  %v1248_v54 = vor.u32 %v1503_v49, %v1245_v51  ;;  %v1227_v55 = vld [vmem:[#allocation8 + $0x128] sm:$0xf]  ;;  %v1467_v57 = vld [vmem:[#allocation8 + $0x2c] sm:$0xf]  ;;  %v1229_v61 = vld [vmem:[#allocation8 + $0x138] sm:$0xf0] }
  0x47   :  { %644 = vmatpush.bf16.msrb.mxu2 %v1180_v59  ;;  %v1101_v59 = vld [vmem:[#allocation8 + $0x38] sm:$0xf0]  ;;  %v1499_v60 = vld [vmem:[#allocation8 + $0x12c] sm:$0xf]  ;;  %v1465_v0 = vld [vmem:[#allocation8 + $0x14] sm:$0xf0] }
  0x48   :  { %671 = vmatpush.bf16.msra.mxu0 %v1200_v53  ;;  %v1469_v53 = vld [vmem:[#allocation8 + $0x34] sm:$0xf0]  ;;  %v1104_v1 = vor.u32 %v1467_v57, %v1101_v59  ;;  %v1232_v2 = vor.u32 %v1499_v60, %v1229_v61  ;;  %v1463_v5 = vld [vmem:[#allocation8 + $0xc] sm:$0xf]  ;;  %v1085_v6 = vld [vmem:[#allocation8 + $0x18] sm:$0xf0] }
  0x49   :  { %685 = vmatpush.bf16.msra.mxu1 %v1328_v56  ;;  %658 = vmatpush.bf16.msrb.mxu3 %v1308_v63  ;;  %v1501_v56 = vld [vmem:[#allocation8 + $0x134] sm:$0xf0]  ;;  %v1100_v58 = vor.u32 %v1469_v53, %v1099_v52  ;;  %v1083_v63 = vld [vmem:[#allocation8 + $0x8] sm:$0xf]  ;;  %v1495_v7 = vld [vmem:[#allocation8 + $0x10c] sm:$0xf]  ;;  %v1088_v11 = vor.u32 %v1463_v5, %v1085_v6 }
  0x4a   :  { %v1228_v62 = vor.u32 %v1501_v56, %v1227_v55  ;;  %v1084_v9 = vor.u32 %v1465_v0, %v1083_v63  ;;  %v1541_v29 = vld [vmem:[#allocation11 + $0x78] sm:$0xff]  ;;  %v1532_v33 = vld [vmem:[#allocation11 + $0x30] sm:$0xff]  ;;  %v1539_v34 = vld [vmem:[#allocation11 + $0x68] sm:$0xff]  ;;  %s1762_s12 = smov [#allocation13]   ;;  %s1035_s15 = sshll.u32 %s1842_s7, 4  ;;  %s1036_s15 = int_to_ptr.hbm [resolvable:$true] %s1035_s15 }
  0x4b   :  { %645 = vmatpush.bf16.msrb.mxu2 %v1164_v8  ;;  %v1213_v8 = vld [vmem:[#allocation8 + $0x118] sm:$0xf0]  ;;  %v1538_v35 = vld [vmem:[#allocation11 + $0x60] sm:$0xff]  ;;  %v1536_v40 = vld [vmem:[#allocation11 + $0x50] sm:$0xff]  ;;  %s1033_s1 = sshll.u32 %s1762_s12, 4  ;;  %s1034_s1 = int_to_ptr.vmem [resolvable:$true] %s1033_s1 }
  0x4c   :  { %672 = vmatpush.bf16.msra.mxu0 %v1184_v3  ;;  %v1211_v3 = vld [vmem:[#allocation8 + $0x108] sm:$0xf]  ;;  %v1533_v30 = vld [vmem:[#allocation11 + $0x38] sm:$0xff]  ;;  %v1535_v44 = vld [vmem:[#allocation11 + $0x48] sm:$0xff] }
  0x4d   :  { %686 = vmatpush.bf16.msra.mxu1 %v1312_v4  ;;  %659 = vmatpush.bf16.msrb.mxu3 %v1292_v12  ;;  %v1497_v4 = vld [vmem:[#allocation8 + $0x114] sm:$0xf0]  ;;  %v1216_v12 = vor.u32 %v1495_v7, %v1213_v8  ;;  %v1557_v38 = vld [vmem:[#allocation11 + $0xf8] sm:$0xff]  ;;  %v1530_v39 = vld [vmem:[#allocation11 + $0x20] sm:$0xff] }
  0x4e   :  { %v1212_v10 = vor.u32 %v1497_v4, %v1211_v3  ;;  %v1529_v42 = vld [vmem:[#allocation11 + $0x18] sm:$0xff]  ;;  %v1548_v47 = vld [vmem:[#allocation11 + $0xb0] sm:$0xff]  ;;  %v1534_v48 = vld [vmem:[#allocation11 + $0x40] sm:$0xff] }
  0x4f   :  { %646 = vmatpush.bf16.msrb.mxu2 %v1148_v20  ;;  %v1549_v43 = vld [vmem:[#allocation11 + $0xb8] sm:$0xff]  ;;  %v1554_v49 = vld [vmem:[#allocation11 + $0xe0] sm:$0xff]  ;;  %v1547_v51 = vld [vmem:[#allocation11 + $0xa8] sm:$0xff] }
  0x50   :  { %673 = vmatpush.bf16.msra.mxu0 %v1168_v13  ;;  %v124_v13 = vld [vmem:[#allocation7] sm:$0x3]  ;;  %v1526_v53 = vld [vmem:[#allocation11] sm:$0xff]  ;;  %v1552_v55 = vld [vmem:[#allocation11 + $0xd0] sm:$0xff] }
  0x51   :  { %687 = vmatpush.bf16.msra.mxu1 %v1296_v16  ;;  %660 = vmatpush.bf16.msrb.mxu3 %v1276_v24  ;;  %v126_v16 = vperm.slane %v124_v13, 0  ;;  %v127_v17 = vperm.slane %v124_v13, 1  ;;  %v1553_v52 = vld [vmem:[#allocation11 + $0xd8] sm:$0xff]  ;;  %v1551_v57 = vld [vmem:[#allocation11 + $0xc8] sm:$0xff]  ;;  %v1550_v59 = vld [vmem:[#allocation11 + $0xc0] sm:$0xff] }
  0x52   :  { %v1545_v56 = vld [vmem:[#allocation11 + $0x98] sm:$0xff]  ;;  %v1543_v61 = vld [vmem:[#allocation11 + $0x88] sm:$0xff] }
  0x53   :  { %647 = vmatpush.bf16.msrb.mxu2 %v1132_v32  ;;  %v1540_v32 = vld [vmem:[#allocation11 + $0x70] sm:$0xff]  ;;  %v257_v60 = vld [vmem:[#allocation10] sm:$0xf] }
  0x54   :  { %674 = vmatpush.bf16.msra.mxu0 %v1152_v25  ;;  %v260_v63 = vperm.slane %v257_v60, 1  ;;  %v259_v4 = vperm.slane %v257_v60, 0 }
  0x55   :  { %688 = vmatpush.bf16.msra.mxu1 %v1280_v28  ;;  %661 = vmatpush.bf16.msrb.mxu3 %v1260_v36  ;;  %v1531_v36 = vld [vmem:[#allocation11 + $0x28] sm:$0xff] }
  0x57   :  { %648 = vmatpush.bf16.msrb.mxu2 %v1116_v45  ;;  %v1555_v45 = vld [vmem:[#allocation11 + $0xe8] sm:$0xff] }
  0x58   :  { %675 = vmatpush.bf16.msra.mxu0 %v1136_v37  ;;  %v1537_v37 = vld [vmem:[#allocation11 + $0x58] sm:$0xff] }
  0x59   :  { %689 = vmatpush.bf16.msra.mxu1 %v1264_v41  ;;  %662 = vmatpush.bf16.msrb.mxu3 %v1244_v46  ;;  %v1556_v41 = vld [vmem:[#allocation11 + $0xf0] sm:$0xff] }
  0x5a   :  { %v1528_v46 = vld [vmem:[#allocation11 + $0x10] sm:$0xff] }
  0x5b   :  { %649 = vmatpush.bf16.msrb.mxu2 %v1100_v58  ;;  %v1544_v58 = vld [vmem:[#allocation11 + $0x90] sm:$0xff] }
  0x5c   :  { %676 = vmatpush.bf16.msra.mxu0 %v1120_v50  ;;  %v1527_v50 = vld [vmem:[#allocation11 + $0x8] sm:$0xff] }
  0x5d   :  { %690 = vmatpush.bf16.msra.mxu1 %v1248_v54  ;;  %663 = vmatpush.bf16.msrb.mxu3 %v1228_v62  ;;  %v1546_v54 = vld [vmem:[#allocation11 + $0xa0] sm:$0xff] }
  0x5f   :  { %650 = vmatpush.bf16.msrb.mxu2 %v1084_v9 }
  0x60   :  { %677 = vmatpush.bf16.msra.mxu0 %v1104_v1  ;;  %v1542_v1 = vld [vmem:[#allocation11 + $0x80] sm:$0xff] }
  0x61   :  { %691 = vmatpush.bf16.msra.mxu1 %v1232_v2  ;;  %664 = vmatpush.bf16.msrb.mxu3 %v1212_v10 }
  0x64   :  { %678 = vmatpush.bf16.msra.mxu0 %v1088_v11 }
  0x65   :  { %692 = vmatpush.bf16.msra.mxu1 %v1216_v12 }
  0xa4   :  { %v168_v14 = vpop.f32.mrf.mxu0 }
  0xa5   :  { %v182_v15 = vpop.f32.mrf.mxu1  ;;  %v169_v18 = vadd.f32 %v168_v14, %v126_v16 }
  0xa6   :  { %v183_v19 = vadd.f32 %v182_v15, %v127_v17 }
  0xa7   :  { %v187_v24 = vmax.f32 %v169_v18, 0.0 }
  0xa8   :  { %v188_v26 = vmax.f32 %v183_v19, 0.0 }
  0xac   :  { %v170_v20 = vpop.f32.mrf.mxu0 }
  0xad   :  { %v171_v21 = vadd.f32 %v170_v20, %v126_v16  ;;  %v184_v22 = vpop.f32.mrf.mxu1 }
  0xae   :  { %v185_v23 = vadd.f32 %v184_v22, %v127_v17 }
  0xaf   :  { %v189_v25 = vmax.f32 %v171_v21, 0.0  ;;  %v262_v21 = vperm.slane %v257_v60, 3 }
  0xb0   :  { %v190_v27 = vmax.f32 %v185_v23, 0.0 }
  0xb1   :  { %v191_v28 = vpack.c.bf16 %v189_v25, %v187_v24 }
  0xb2   :  { %v192_v31 = vpack.c.bf16 %v190_v27, %v188_v26 }
  0xb3   :  { %595 = vmatmul.bf16.vlgmr.msra.gmra.mxu2 %v191_v28  ;;  %623 = vmatmul.bf16.vlgmr.msrb.gmra.mxu0 %v191_v28 }
  0xb4   :  { %609 = vmatmul.bf16.vlgmr.msra.gmra.mxu3 %v192_v31  ;;  %637 = vmatmul.bf16.vlgmr.msrb.gmra.mxu1 %v192_v31 }
  0xb5   :  { %985 = vmatpush.bf16.msra.mxu3 %v1541_v29  ;;  %971 = vmatpush.bf16.msra.mxu2 %v1533_v30 }
  0xb6   :  { %1013 = vmatpush.bf16.msrb.mxu1 %v1557_v38  ;;  %999 = vmatpush.bf16.msrb.mxu0 %v1549_v43 }
  0xb9   :  { %986 = vmatpush.bf16.msra.mxu3 %v1540_v32  ;;  %972 = vmatpush.bf16.msra.mxu2 %v1532_v33 }
  0xba   :  { %1014 = vmatpush.bf16.msrb.mxu1 %v1556_v41  ;;  %1000 = vmatpush.bf16.msrb.mxu0 %v1548_v47 }
  0xbd   :  { %987 = vmatpush.bf16.msra.mxu3 %v1539_v34  ;;  %973 = vmatpush.bf16.msra.mxu2 %v1531_v36 }
  0xbe   :  { %1015 = vmatpush.bf16.msrb.mxu1 %v1555_v45  ;;  %1001 = vmatpush.bf16.msrb.mxu0 %v1547_v51 }
  0xc1   :  { %988 = vmatpush.bf16.msra.mxu3 %v1538_v35  ;;  %974 = vmatpush.bf16.msra.mxu2 %v1530_v39 }
  0xc2   :  { %1016 = vmatpush.bf16.msrb.mxu1 %v1554_v49  ;;  %1002 = vmatpush.bf16.msrb.mxu0 %v1546_v54 }
  0xc3   :  { %651 = vmatmul.bf16.vlgmr.msrb.gmra.mxu2 %v191_v28  ;;  %679 = vmatmul.bf16.vlgmr.msra.gmra.mxu0 %v191_v28  ;;  %v261_v28 = vperm.slane %v257_v60, 2 }
  0xc4   :  { %665 = vmatmul.bf16.vlgmr.msrb.gmra.mxu3 %v192_v31  ;;  %693 = vmatmul.bf16.vlgmr.msra.gmra.mxu1 %v192_v31 }
  0xc5   :  { %989 = vmatpush.bf16.msra.mxu3 %v1537_v37  ;;  %975 = vmatpush.bf16.msra.mxu2 %v1529_v42 }
  0xc6   :  { %1017 = vmatpush.bf16.msrb.mxu1 %v1553_v52  ;;  %1003 = vmatpush.bf16.msrb.mxu0 %v1545_v56 }
  0xc9   :  { %990 = vmatpush.bf16.msra.mxu3 %v1536_v40  ;;  %976 = vmatpush.bf16.msra.mxu2 %v1528_v46 }
  0xca   :  { %1018 = vmatpush.bf16.msrb.mxu1 %v1552_v55  ;;  %1004 = vmatpush.bf16.msrb.mxu0 %v1544_v58 }
  0xcd   :  { %991 = vmatpush.bf16.msra.mxu3 %v1535_v44  ;;  %977 = vmatpush.bf16.msra.mxu2 %v1527_v50 }
  0xce   :  { %1019 = vmatpush.bf16.msrb.mxu1 %v1551_v57  ;;  %1005 = vmatpush.bf16.msrb.mxu0 %v1543_v61 }
  0xd1   :  { %992 = vmatpush.bf16.msra.mxu3 %v1534_v48  ;;  %978 = vmatpush.bf16.msra.mxu2 %v1526_v53  ;;  %v1571_v48 = vld [vmem:[%s1841_s6] ss:$0 sm:$0xff] }
  0xd2   :  { %1020 = vmatpush.bf16.msrb.mxu1 %v1550_v59  ;;  %1006 = vmatpush.bf16.msrb.mxu0 %v1542_v1 }
 0x130   :  { %v624_v62 = vpop.f32.mrf.mxu0 }
 0x131   :  { %v638_v0 = vpop.f32.mrf.mxu1  ;;  %v625_v2 = vadd.f32 %v624_v62, %v260_v63 }
 0x133   :  { %v639_v7 = vadd.f32 %v638_v0, %v625_v2 }
 0x135   :  { %v700_v12 = vmax.f32 %v639_v7, 0.0 }
 0x136   :  { %v596_v3 = vpop.f32.mrf.mxu2 }
 0x137   :  { %v610_v5 = vpop.f32.mrf.mxu3  ;;  %v597_v10 = vadd.f32 %v596_v3, %v259_v4 }
 0x138   :  { %v626_v6 = vpop.f32.mrf.mxu0 }
 0x139   :  { %v627_v8 = vadd.f32 %v626_v6, %v260_v63  ;;  %v640_v9 = vpop.f32.mrf.mxu1  ;;  %v611_v15 = vadd.f32 %v610_v5, %v597_v10 }
 0x13b   :  { %v641_v11 = vadd.f32 %v640_v9, %v627_v8  ;;  %v699_v23 = vmax.f32 %v611_v15, 0.0 }
 0x13d   :  { %v704_v13 = vmax.f32 %v641_v11, 0.0 }
 0x13e   :  { %v598_v14 = vpop.f32.mrf.mxu2 }
 0x13f   :  { %v708_v16 = vpack.c.bf16 %v704_v13, %v700_v12  ;;  %v599_v17 = vadd.f32 %v598_v14, %v259_v4  ;;  %v612_v18 = vpop.f32.mrf.mxu3 }
 0x140   :  { %v680_v19 = vpop.f32.mrf.mxu0 }
 0x141   :  { %v613_v20 = vadd.f32 %v612_v18, %v599_v17  ;;  %v694_v22 = vpop.f32.mrf.mxu1  ;;  %993 = vmatmul.bf16.vlgmr.msra.gmra.mxu3 %v708_v16  ;;  %v681_v26 = vadd.f32 %v680_v19, %v262_v21 }
 0x143   :  { %v703_v24 = vmax.f32 %v613_v20, 0.0  ;;  %v695_v31 = vadd.f32 %v694_v22, %v681_v26 }
 0x145   :  { %v707_v25 = vpack.c.bf16 %v703_v24, %v699_v23  ;;  %v702_v36 = vmax.f32 %v695_v31, 0.0 }
 0x146   :  { %v652_v27 = vpop.f32.mrf.mxu2 }
 0x147   :  { %v666_v29 = vpop.f32.mrf.mxu3  ;;  %979 = vmatmul.bf16.vlgmr.msra.gmra.mxu2 %v707_v25  ;;  %v653_v34 = vadd.f32 %v652_v27, %v261_v28 }
 0x148   :  { %v682_v30 = vpop.f32.mrf.mxu0 }
 0x149   :  { %v683_v32 = vadd.f32 %v682_v30, %v262_v21  ;;  %v696_v33 = vpop.f32.mrf.mxu1  ;;  %v667_v39 = vadd.f32 %v666_v29, %v653_v34 }
 0x14b   :  { %v697_v35 = vadd.f32 %v696_v33, %v683_v32  ;;  %v701_v44 = vmax.f32 %v667_v39, 0.0 }
 0x14d   :  { %v706_v37 = vmax.f32 %v697_v35, 0.0 }
 0x14e   :  { %v654_v38 = vpop.f32.mrf.mxu2 }
 0x14f   :  { %v710_v40 = vpack.c.bf16 %v706_v37, %v702_v36  ;;  %v655_v41 = vadd.f32 %v654_v38, %v261_v28  ;;  %v668_v42 = vpop.f32.mrf.mxu3 }
 0x151   :  { %v669_v43 = vadd.f32 %v668_v42, %v655_v41  ;;  %1021 = vmatmul.bf16.vlgmr.msrb.gmra.mxu1 %v710_v40 }
 0x153   :  { %v705_v45 = vmax.f32 %v669_v43, 0.0 }
 0x155   :  { %v709_v46 = vpack.c.bf16 %v705_v45, %v701_v44 }
 0x157   :  { %1007 = vmatmul.bf16.vlgmr.msrb.gmra.mxu0 %v709_v46 }
 0x1c4   :  { %v994_v50 = vpop.f32.mrf.mxu3 }
 0x1ca   :  { %v980_v47 = vpop.f32.mrf.mxu2 }
 0x1cb   :  { %v981_v49 = vadd.f32 %v1571_v48, %v980_v47 }
 0x1cc   :  { %v996_v58 = vpop.f32.mrf.mxu3 }
 0x1cd   :  { %v995_v52 = vadd.f32 %v994_v50, %v981_v49 }
 0x1ce   :  { %v1022_v51 = vpop.f32.mrf.mxu1 }
 0x1d2   :  { %v982_v53 = vpop.f32.mrf.mxu2 }
 0x1d3   :  { %v983_v56 = vadd.f32 %v1571_v48, %v982_v53 }
 0x1d4   :  { %v1008_v54 = vpop.f32.mrf.mxu0 }
 0x1d5   :  { %v1009_v55 = vadd.f32 %v1008_v54, %v995_v52  ;;  %v997_v59 = vadd.f32 %v996_v58, %v983_v56 }
 0x1d6   :  { %v1024_v62 = vpop.f32.mrf.mxu1 }
 0x1d7   :  { %v1023_v57 = vadd.f32 %v1022_v51, %v1009_v55 }
 0x1d9   :  { %1027 = vst [vmem:[#allocation13] sm:$0xff] %v1023_v57 }
 0x1dc   :  { %v1010_v60 = vpop.f32.mrf.mxu0 }
 0x1dd   :  { %v1011_v61 = vadd.f32 %v1010_v60, %v997_v59 }
 0x1df   :  { %v1025_v63 = vadd.f32 %v1024_v62, %v1011_v61 }
 0x1e1   :  { %1028 = vst [vmem:[#allocation13 + $0x8] sm:$0xff] %v1025_v63 }
 0x1e2   :  { %1041 = dma.vmem_to_hbm [thread:$0]  %s1034_s1, 256, %s1036_s15, [#allocation4], %s1751_s9, %s1751_s9, %s1752_s10  }
 0x1e3   :  { %1748 = dma.done.wait [#allocation4], 256  }
 0x1e4   :  { %1749 = vsyncadd [#allocation4], 4294967040 }
 0x1e5   :  { %1046 = vsyncpa [#allocation3], 1 }
 0x1e6   :  { %1047 = vsyncpa [#allocation6], 1 }
 0x1e7   :  { %1048 = vsyncpa [#allocation9], 1 }
 0x1e8   :  { %1049 = vsyncpa [#allocation12], 1 }
 0x1e9   :  { %1050 = vsyncpa [#allocation4], 1 }

</bundles_post_ra>
